<compile_context>
chip_gen: v7x
topology: tpu7x:2x2x1
jax: 0.10.0
libtpu: 0.0.40
codegen_flags: <defaults>
</compile_context>

<pallas_src>
import numpy as np
import jax
import jax.numpy as jnp
from jax.experimental import pallas as pl
from jax.experimental.pallas import tpu as pltpu

_LANE = 128
_MAX_TILE_ROWS = 1024  # (rows, 128) f32 tile = 512 KiB; 9 planes double-buffered ~= 9 MiB


# ----------------------------------------------------------------------------
# Wavelet frame (kerunc generate_wavelet / wv_norm / Fwv equivalents)
# ----------------------------------------------------------------------------
def generate_wavelet(frame=1, dim=2):
    # piecewise-linear B-spline framelet (frame=1): 9 separable 2D filters
    assert frame == 1 and dim == 2
    d1 = np.array([1.0, 2.0, 1.0]) / 4.0
    d2 = np.array([1.0, 0.0, -1.0]) / 4.0 * np.sqrt(2.0)
    d3 = np.array([-1.0, 2.0, -1.0]) / 4.0
    d = [d1, d2, d3]
    dec2d = [np.outer(a, b) for a in d for b in d]
    return dec2d, None


def wv_norm(dec2d):
    return np.array([np.linalg.norm(f) for f in dec2d], dtype=np.float32)


def psf2otf(psf, shape):
    H, W = shape
    kh, kw = psf.shape
    pad = jnp.zeros((H, W), jnp.float32).at[:kh, :kw].set(psf)
    pad = jnp.roll(pad, shift=(-(kh // 2), -(kw // 2)), axis=(0, 1))
    return jnp.fft.fft2(pad)  # complex64 (H, W)


def Fwv(dec2d, shape):
    return jnp.stack([psf2otf(jnp.asarray(f, jnp.float32), shape) for f in dec2d])


# ----------------------------------------------------------------------------
# Pallas kernel: Db_Inv frequency-domain solve (lane-dense elementwise)
#   complex planes arrive as separate real/imag refs of shape (1, th, W);
#   w2 (batch-invariant) as (th, W)
# ----------------------------------------------------------------------------
def dbinv_kernel(kr_ref, ki_ref, yr_ref, yi_ref, zr_ref, zi_ref, w2_ref,
                 or_ref, oi_ref):
    kr = kr_ref[0]
    ki = ki_ref[0]
    yr = yr_ref[0]
    yi = yi_ref[0]
    zr = zr_ref[0]
    zi = zi_ref[0]
    w2 = w2_ref[...]

    num_r = kr * yr + ki * yi + w2 * zr          # conj(K) * Fy + w2 * Fz  (real)
    num_i = kr * yi - ki * yr + w2 * zi          #                         (imag)
    den = kr * kr + ki * ki + w2                 # |K|^2 + w2
    inv = pl.reciprocal(den, approx=False)       # one reciprocal + two muls instead of 2 divs

    or_ref[0] = num_r * inv
    oi_ref[0] = num_i * inv


# ----------------------------------------------------------------------------
# Tiling helpers
# ----------------------------------------------------------------------------
def _tiling(hw):
    """Generic lane-dense layout: pad HW so rows is a multiple of the tile height."""
    block = 8 * _LANE
    rows_min = (-(-hw // block)) * 8                    # multiple of 8
    tr = min(_MAX_TILE_ROWS, rows_min)                  # multiple of 8
    rows = (-(-rows_min // tr)) * tr                    # pad rows up to tile multiple
    return rows * _LANE, rows, tr


def _fast_row_tile(H, W):
    """Largest multiple-of-8 divisor of H with th*W within the tile budget."""
    budget = (_MAX_TILE_ROWS * _LANE) // W
    budget -= budget % 8
    budget = max(budget, 8)
    best, th, lim = 8, 8, min(H, budget)
    while th <= lim:
        if H % th == 0:
            best = th
        th += 8
    return best


def _pack_real(x, padded_hw, rows):
    # real (N, H, W) f32 -> (N, rows, 128), zero padded, lane-dense
    n = x.shape[0]
    f = x.reshape(n, -1)
    pad = padded_hw - f.shape[1]
    if pad:
        f = jnp.pad(f, ((0, 0), (0, pad)))
    return f.reshape(n, rows, _LANE)


# ----------------------------------------------------------------------------
# Frequency-domain solve wrapper
# ----------------------------------------------------------------------------
def dbinv_freq_solve(Fker, Fy, Fz, w2):
    """Fx = (conj(K)*Fy + w2*Fz) / (|K|^2 + w2), elementwise over (B, H, W).

    Fker may be (H, W) (shared across the batch -> never re-fetched per image)
    or (B, H, W) (per-image blur kernels)."""
    B, H, W = Fy.shape
    Kb = Fker if Fker.ndim == 3 else Fker[None]
    shared_k = Kb.shape[0] == 1
    f32 = jnp.float32

    kr, ki = jnp.real(Kb).astype(f32), jnp.imag(Kb).astype(f32)
    yr, yi = jnp.real(Fy).astype(f32), jnp.imag(Fy).astype(f32)
    zr, zi = jnp.real(Fz).astype(f32), jnp.imag(Fz).astype(f32)
    w2f = w2.astype(f32)

    fast = (H % 8 == 0) and (W % _LANE == 0)
    if fast:
        # aligned fast path: no flatten / pad / fold packing at all
        th = _fast_row_tile(H, W)
        grid = (H // th, B)                      # B innermost -> K / w2 tiles stay resident
        c_block, w_block = (1, th, W), (th, W)
        out_shape = (jax.ShapeDtypeStruct((B, H, W), f32),) * 2
    else:
        hw = H * W
        padded, rows, tr = _tiling(hw)
        kr, ki = _pack_real(kr, padded, rows), _pack_real(ki, padded, rows)
        yr, yi = _pack_real(yr, padded, rows), _pack_real(yi, padded, rows)
        zr, zi = _pack_real(zr, padded, rows), _pack_real(zi, padded, rows)
        # pad denominator term with 1 so the (discarded) padded lanes stay finite
        w2f = jnp.pad(w2f.reshape(-1), (0, padded - hw),
                      constant_values=1.0).reshape(rows, _LANE)
        grid = (rows // tr, B)
        c_block, w_block = (1, tr, _LANE), (tr, _LANE)
        out_shape = (jax.ShapeDtypeStruct((B, rows, _LANE), f32),) * 2

    k_map = (lambda t, b: (0, t, 0)) if shared_k else (lambda t, b: (b, t, 0))
    c_map = lambda t, b: (b, t, 0)
    w_map = lambda t, b: (t, 0)

    k_spec = pl.BlockSpec(c_block, k_map)
    c_spec = pl.BlockSpec(c_block, c_map)
    w_spec = pl.BlockSpec(w_block, w_map)

    out_r, out_i = pl.pallas_call(
        dbinv_kernel,
        grid=grid,
        in_specs=[k_spec, k_spec, c_spec, c_spec, c_spec, c_spec, w_spec],
        out_specs=(c_spec, c_spec),
        out_shape=out_shape,
        compiler_params=pltpu.CompilerParams(
            dimension_semantics=("parallel", "parallel"),
            vmem_limit_bytes=32 << 20),
    )(kr, ki, yr, yi, zr, zi, w2f)

    if fast:
        return jax.lax.complex(out_r, out_i)
    hw = H * W
    flat_r = out_r.reshape(B, -1)[:, :hw]
    flat_i = out_i.reshape(B, -1)[:, :hw]
    return jax.lax.complex(flat_r, flat_i).reshape(B, H, W)


# ----------------------------------------------------------------------------
# Db_Inv module equivalent
# ----------------------------------------------------------------------------
class DbInv:
    """JAX/Pallas equivalent of kerunc's Db_Inv(nn.Module)."""

    def __init__(self, lmd):
        self.dec2d, _ = generate_wavelet(frame=1)
        self.chn_num = len(self.dec2d)
        self.lmd = jnp.asarray(lmd, jnp.float32).reshape(self.chn_num)

    def __call__(self, y, Fker, z=None, u=None):
        if z is None:
            z = jnp.zeros_like(y)
        if u is None:
            u = jnp.zeros_like(y)
        shape = y.shape[-2:]
        Fw = Fwv(self.dec2d, shape)                                        # (9, H, W) complex
        # batch-invariant wavelet term, hoisted out of the Pallas kernel
        w2 = jnp.sum(self.lmd.reshape(-1, 1, 1)
                     * (jnp.real(Fw) ** 2 + jnp.imag(Fw) ** 2), axis=0)    # (H, W) real
        # TODO(synk): fft2/ifft2 remain plain-JAX XLA ops (no Pallas TPU FFT primitive)
        Fy = jnp.fft.fft2(y[:, 0] - u[:, 0])
        Fz = jnp.fft.fft2(z[:, 0])
        Fx = dbinv_freq_solve(Fker, Fy, Fz, w2)
        return jnp.real(jnp.fft.ifft2(Fx))[:, None]                        # (B, 1, H, W)


# ----------------------------------------------------------------------------
# Pure-JAX reference (for a self-check)
# ----------------------------------------------------------------------------
def db_inv_reference(y, Fker, lmd, dec2d, z=None, u=None):
    if z is None:
        z = jnp.zeros_like(y)
    if u is None:
        u = jnp.zeros_like(y)
    Fw = Fwv(dec2d, y.shape[-2:])
    w2 = jnp.sum(lmd.reshape(-1, 1, 1)
                 * (jnp.real(Fw) ** 2 + jnp.imag(Fw) ** 2), axis=0)
    Fy = jnp.fft.fft2(y[:, 0] - u[:, 0])
    Fz = jnp.fft.fft2(z[:, 0])
    K = Fker if Fker.ndim == 3 else Fker[None]
    num = jnp.conj(K) * Fy + w2 * Fz
    den = jnp.abs(K) ** 2 + w2
    return jnp.real(jnp.fft.ifft2(num / den))[:, None]


# ----------------------------------------------------------------------------
if __name__ == "__main__":
    dec2d, _ = generate_wavelet(frame=1)
    lmd = jnp.asarray(0.01 * np.ones(len(dec2d), np.float32) / wv_norm(dec2d))
    model = DbInv(lmd)

    psf = jnp.array([[1., 2., 1.], [2., 4., 2.], [1., 2., 1.]], jnp.float32)
    psf = psf / jnp.sum(psf)

    # --- Case A: generic packed path (W not lane-aligned), batched Fker -----
    B, H, W = 2, 16, 16
    ky, kz, ku = jax.random.split(jax.random.PRNGKey(0), 3)
    y = jax.random.normal(ky, (B, 1, H, W), jnp.float32)
    z = jax.random.normal(kz, (B, 1, H, W), jnp.float32)
    u = 0.1 * jax.random.normal(ku, (B, 1, H, W), jnp.float32)
    Fker_b = jnp.broadcast_to(psf2otf(psf, (H, W)), (B, H, W))

    xa0 = model(y, Fker_b)                      # z = u = None default path
    xa1 = model(y, Fker_b, z=z, u=u)            # full ADMM-style path
    jax.block_until_ready(xa1)
    ra0 = db_inv_reference(y, Fker_b, lmd, dec2d)
    ra1 = db_inv_reference(y, Fker_b, lmd, dec2d, z=z, u=u)
    err_a = max(float(jnp.max(jnp.abs(xa0 - ra0))),
                float(jnp.max(jnp.abs(xa1 - ra1))))

    # --- Case B: lane-aligned fast path, shared (unbatched) Fker ------------
    H2, W2 = 16, 128
    ky2, kz2 = jax.random.split(jax.random.PRNGKey(1), 2)
    y2 = jax.random.normal(ky2, (B, 1, H2, W2), jnp.float32)
    z2 = jax.random.normal(kz2, (B, 1, H2, W2), jnp.float32)
    Fker_s = psf2otf(psf, (H2, W2))             # (H2, W2) shared across the batch
    xb = model(y2, Fker_s, z=z2)
    jax.block_until_ready(xb)
    rb = db_inv_reference(y2, Fker_s, lmd, dec2d, z=z2)
    err_b = float(jnp.max(jnp.abs(xb - rb)))

    err = max(err_a, err_b)
    assert err < 1e-4, f"mismatch vs reference: {err}"
    print("KERNEL_OK")
</pallas_src>

<mosaic_0001>
module attributes {stable_mosaic.version = 11 : i64} {
  func.func @dbinv_kernel(%arg0: i32, %arg1: i32, %arg2: memref<1x8x128xf32, #tpu.memory_space<vmem>>, %arg3: memref<1x8x128xf32, #tpu.memory_space<vmem>>, %arg4: memref<1x8x128xf32, #tpu.memory_space<vmem>>, %arg5: memref<1x8x128xf32, #tpu.memory_space<vmem>>, %arg6: memref<1x8x128xf32, #tpu.memory_space<vmem>>, %arg7: memref<1x8x128xf32, #tpu.memory_space<vmem>>, %arg8: memref<8x128xf32, #tpu.memory_space<vmem>>, %arg9: memref<1x8x128xf32, #tpu.memory_space<vmem>>, %arg10: memref<1x8x128xf32, #tpu.memory_space<vmem>>) attributes {dimension_semantics = [#tpu.dimension_semantics<parallel>, #tpu.dimension_semantics<parallel>], iteration_bounds = array<i64: 1, 2>, scalar_prefetch = 0 : i64, scratch_operands = 0 : i64, tpu.core_type = #tpu.core_type<tc>, window_params = [{transform_indices = @transform_0, window_bounds = array<i64: 1, 8, 128>}, {transform_indices = @transform_1, window_bounds = array<i64: 1, 8, 128>}, {transform_indices = @transform_2, window_bounds = array<i64: 1, 8, 128>}, {transform_indices = @transform_3, window_bounds = array<i64: 1, 8, 128>}, {transform_indices = @transform_4, window_bounds = array<i64: 1, 8, 128>}, {transform_indices = @transform_5, window_bounds = array<i64: 1, 8, 128>}, {transform_indices = @transform_6, window_bounds = array<i64: 8, 128>}, {transform_indices = @transform_7, window_bounds = array<i64: 1, 8, 128>}, {transform_indices = @transform_8, window_bounds = array<i64: 1, 8, 128>}]} {
    %c0 = arith.constant 0 : index
    %c0_0 = arith.constant 0 : index
    %c0_1 = arith.constant 0 : index
    %0 = vector.load %arg2[%c0, %c0_0, %c0_1] : memref<1x8x128xf32, #tpu.memory_space<vmem>>, vector<1x8x128xf32>
    %1 = vector.shape_cast %0 : vector<1x8x128xf32> to vector<8x128xf32>
    %c0_2 = arith.constant 0 : index
    %c0_3 = arith.constant 0 : index
    %c0_4 = arith.constant 0 : index
    %2 = vector.load %arg3[%c0_2, %c0_3, %c0_4] : memref<1x8x128xf32, #tpu.memory_space<vmem>>, vector<1x8x128xf32>
    %3 = vector.shape_cast %2 : vector<1x8x128xf32> to vector<8x128xf32>
    %c0_5 = arith.constant 0 : index
    %c0_6 = arith.constant 0 : index
    %c0_7 = arith.constant 0 : index
    %4 = vector.load %arg4[%c0_5, %c0_6, %c0_7] : memref<1x8x128xf32, #tpu.memory_space<vmem>>, vector<1x8x128xf32>
    %5 = vector.shape_cast %4 : vector<1x8x128xf32> to vector<8x128xf32>
    %c0_8 = arith.constant 0 : index
    %c0_9 = arith.constant 0 : index
    %c0_10 = arith.constant 0 : index
    %6 = vector.load %arg5[%c0_8, %c0_9, %c0_10] : memref<1x8x128xf32, #tpu.memory_space<vmem>>, vector<1x8x128xf32>
    %7 = vector.shape_cast %6 : vector<1x8x128xf32> to vector<8x128xf32>
    %c0_11 = arith.constant 0 : index
    %c0_12 = arith.constant 0 : index
    %c0_13 = arith.constant 0 : index
    %8 = vector.load %arg6[%c0_11, %c0_12, %c0_13] : memref<1x8x128xf32, #tpu.memory_space<vmem>>, vector<1x8x128xf32>
    %9 = vector.shape_cast %8 : vector<1x8x128xf32> to vector<8x128xf32>
    %c0_14 = arith.constant 0 : index
    %c0_15 = arith.constant 0 : index
    %c0_16 = arith.constant 0 : index
    %10 = vector.load %arg7[%c0_14, %c0_15, %c0_16] : memref<1x8x128xf32, #tpu.memory_space<vmem>>, vector<1x8x128xf32>
    %11 = vector.shape_cast %10 : vector<1x8x128xf32> to vector<8x128xf32>
    %c0_17 = arith.constant 0 : index
    %c0_18 = arith.constant 0 : index
    %12 = vector.load %arg8[%c0_17, %c0_18] : memref<8x128xf32, #tpu.memory_space<vmem>>, vector<8x128xf32>
    %13 = arith.mulf %1, %5 : vector<8x128xf32>
    %14 = arith.mulf %3, %7 : vector<8x128xf32>
    %15 = arith.addf %13, %14 : vector<8x128xf32>
    %16 = arith.mulf %12, %9 : vector<8x128xf32>
    %17 = arith.addf %15, %16 : vector<8x128xf32>
    %18 = arith.mulf %1, %7 : vector<8x128xf32>
    %19 = arith.mulf %3, %5 : vector<8x128xf32>
    %20 = arith.subf %18, %19 : vector<8x128xf32>
    %21 = arith.mulf %12, %11 : vector<8x128xf32>
    %22 = arith.addf %20, %21 : vector<8x128xf32>
    %23 = arith.mulf %1, %1 : vector<8x128xf32>
    %24 = arith.mulf %3, %3 : vector<8x128xf32>
    %25 = arith.addf %23, %24 : vector<8x128xf32>
    %26 = arith.addf %25, %12 : vector<8x128xf32>
    %27 = tpu.reciprocal %26 : vector<8x128xf32> -> vector<8x128xf32>
    %28 = arith.mulf %17, %27 : vector<8x128xf32>
    %c0_19 = arith.constant 0 : index
    %c0_20 = arith.constant 0 : index
    %c0_21 = arith.constant 0 : index
    %29 = vector.load %arg9[%c0_19, %c0_20, %c0_21] : memref<1x8x128xf32, #tpu.memory_space<vmem>>, vector<1x8x128xf32>
    %30 = vector.shape_cast %29 : vector<1x8x128xf32> to vector<8x128xf32>
    %31 = vector.shape_cast %28 : vector<8x128xf32> to vector<1x8x128xf32>
    tpu.vector_store %arg9[%c0_19, %c0_20, %c0_21], %31 {strides = array<i32>} : memref<1x8x128xf32, #tpu.memory_space<vmem>>, vector<1x8x128xf32>,
    %32 = arith.mulf %22, %27 : vector<8x128xf32>
    %c0_22 = arith.constant 0 : index
    %c0_23 = arith.constant 0 : index
    %c0_24 = arith.constant 0 : index
    %33 = vector.load %arg10[%c0_22, %c0_23, %c0_24] : memref<1x8x128xf32, #tpu.memory_space<vmem>>, vector<1x8x128xf32>
    %34 = vector.shape_cast %33 : vector<1x8x128xf32> to vector<8x128xf32>
    %35 = vector.shape_cast %32 : vector<8x128xf32> to vector<1x8x128xf32>
    tpu.vector_store %arg10[%c0_22, %c0_23, %c0_24], %35 {strides = array<i32>} : memref<1x8x128xf32, #tpu.memory_space<vmem>>, vector<1x8x128xf32>,
    return
  }
  func.func @transform_0(%arg0: i32, %arg1: i32) -> (i32, i32, i32) {
    %c0_i32 = arith.constant 0 : i32
    %c0_i32_0 = arith.constant 0 : i32
    return %arg1, %arg0, %c0_i32 : i32, i32, i32
  }
  func.func @transform_1(%arg0: i32, %arg1: i32) -> (i32, i32, i32) {
    %c0_i32 = arith.constant 0 : i32
    %c0_i32_0 = arith.constant 0 : i32
    return %arg1, %arg0, %c0_i32 : i32, i32, i32
  }
  func.func @transform_2(%arg0: i32, %arg1: i32) -> (i32, i32, i32) {
    %c0_i32 = arith.constant 0 : i32
    %c0_i32_0 = arith.constant 0 : i32
    return %arg1, %arg0, %c0_i32 : i32, i32, i32
  }
  func.func @transform_3(%arg0: i32, %arg1: i32) -> (i32, i32, i32) {
    %c0_i32 = arith.constant 0 : i32
    %c0_i32_0 = arith.constant 0 : i32
    return %arg1, %arg0, %c0_i32 : i32, i32, i32
  }
  func.func @transform_4(%arg0: i32, %arg1: i32) -> (i32, i32, i32) {
    %c0_i32 = arith.constant 0 : i32
    %c0_i32_0 = arith.constant 0 : i32
    return %arg1, %arg0, %c0_i32 : i32, i32, i32
  }
  func.func @transform_5(%arg0: i32, %arg1: i32) -> (i32, i32, i32) {
    %c0_i32 = arith.constant 0 : i32
    %c0_i32_0 = arith.constant 0 : i32
    return %arg1, %arg0, %c0_i32 : i32, i32, i32
  }
  func.func @transform_6(%arg0: i32, %arg1: i32) -> (i32, i32) {
    %c0_i32 = arith.constant 0 : i32
    %c0_i32_0 = arith.constant 0 : i32
    return %arg0, %c0_i32 : i32, i32
  }
  func.func @transform_7(%arg0: i32, %arg1: i32) -> (i32, i32, i32) {
    %c0_i32 = arith.constant 0 : i32
    %c0_i32_0 = arith.constant 0 : i32
    return %arg1, %arg0, %c0_i32 : i32, i32, i32
  }
  func.func @transform_8(%arg0: i32, %arg1: i32) -> (i32, i32, i32) {
    %c0_i32 = arith.constant 0 : i32
    %c0_i32_0 = arith.constant 0 : i32
    return %arg1, %arg0, %c0_i32 : i32, i32, i32
  }
}

</mosaic_0001>

<bundles_post_ra>
// kernel: tpu_custom_call.1
= control target key start
LH: loop header
LB: loop body
LE: loop exit
PB: predicated region body
PF: predicated region fallthrough
CT: control target
= control target key end

     0   :  { %s1721_s0 = inlined_call_operand.hbm [shape: f32[2,8,128], index: 0, kind: input, shape index: {}]   ;;  %s1722_s1 = inlined_call_operand.hbm [shape: f32[2,8,128], index: 1, kind: input, shape index: {}]   ;;  %s1723_s2 = inlined_call_operand.hbm [shape: f32[2,8,128], index: 2, kind: input, shape index: {}]   ;;  %s1724_s3 = inlined_call_operand.hbm [shape: f32[2,8,128], index: 3, kind: input, shape index: {}]   ;;  %s1725_s4 = inlined_call_operand.hbm [shape: f32[2,8,128], index: 4, kind: input, shape index: {}]   ;;  %s1726_s5 = inlined_call_operand.vmem [shape: f32[2,8,128], index: 5, kind: input, shape index: {}]   ;;  %s1727_s6 = inlined_call_operand.hbm [shape: f32[8,128], index: 6, kind: input, shape index: {}]   ;;  %s1728_s7 = inlined_call_operand.hbm [shape: f32[2,8,128], index: 7, kind: output, shape index: {0}]   ;;  %s1729_s8 = inlined_call_operand.hbm [shape: f32[2,8,128], index: 8, kind: output, shape index: {1}]  }
   0x1   :  { %1751 = sst [smem:[#allocation29_spill]] %s1721_s0 }
   0x2   :  { %1752 = sst [smem:[#allocation30_spill]] %s1722_s1 }
   0x3   :  { %1753 = sst [smem:[#allocation31_spill]] %s1724_s3 }
   0x4   :  { %1754 = sst [smem:[#allocation32_spill]] %s1728_s7 }
   0x5   :  { %1755 = sst [smem:[#allocation33_spill]] %s1729_s8 }
   0x6   :  { %14 = vsyncpa [#allocation3], 0 }
   0x7   :  { %16 = vsyncpa [#allocation3 + $0x1], 0 }
   0x8   :  { %17 = vsyncpa [#allocation6], 0 }
   0x9   :  { %19 = vsyncpa [#allocation6 + $0x1], 0 }
   0xa   :  { %20 = vsyncpa [#allocation9], 0 }
   0xb   :  { %22 = vsyncpa [#allocation9 + $0x1], 0 }
   0xc   :  { %23 = vsyncpa [#allocation12], 0 }
   0xd   :  { %24 = vsyncpa [#allocation4], 0 }
   0xe   :  { %26 = vsyncpa [#allocation4 + $0x1], 0 }
   0xf   :  { %27 = vsyncpa [#allocation15], 0 }
  0x10   :  { %29 = vsyncpa [#allocation15 + $0x1], 0  ;;  %s1333_s27 = smov 0   ;;  %s1335_s28 = smov 0  }
  0x11   :  { %s1337_s29 = smov 0   ;;  %s1339_s30 = smov 0  }
  0x12   :  { %s1341_s9 = smov 0   ;;  %s1343_s10 = smov 0  }
  0x13 LB: > { %1756 = sst [smem:[#allocation22_spill]] %s1258_s27  ;;  %s44_s11 = sadd.s32 1, %s1274_s9  ;;  %s1278_s10 = sphi %s1343_s10, %s35_s10   ;;  %s1274_s9 = sphi %s1341_s9, %s1797_s9   ;;  %s1270_s30 = sphi %s1339_s30, %s1796_s30   ;;  %s1266_s29 = sphi %s1337_s29, %s1795_s29   ;;  %s1262_s28 = sphi %s1335_s28, %s1799_s28   ;;  %s1258_s27 = sphi %s1333_s27, %s1798_s27  }
  0x14   : > { %1757 = sst [smem:[#allocation23_spill]] %s1266_s29  ;;  %s56_s12 = sadd.s32 1, %s1266_s29 }
  0x15   : > { %1758 = sst [smem:[#allocation24_spill]] %s1274_s9  ;;  %p45_p0 = scmp.ge.s32.totalorder %s44_s11, 2 }
  0x16   : > { %1759 = sst [smem:[#allocation25_spill]] %s1278_s10  ;;  %p1732_p1 = scmp.ne.s32.totalorder %s1266_s29, %s1262_s28 }
  0x17   : > { %p64_p2 = scmp.eq.s32.totalorder %s1278_s10, 0  ;;  %s1801_s11 = smov (%p45_p0, %s44_s11), 0 }
  0x18   : > { %1760 = sst [smem:[#allocation26_spill]] %s1801_s11  ;;  %p920_p5 = scmp.lt.s32.totalorder %s1278_s10, 2 }
  0x19   : > { %p65_p4 = por %p64_p2, %p1732_p1  ;;  %s51_s13 = ssub.s32 %s1274_s9, %s1801_s11 }
  0x1a   : > { %s1730_s14 = sand.u32 1, %s1266_s29   ;;  %p54_p6 = scmp.eq.s32.totalorder %s51_s13, 0 }
  0x1b   : > { %s1380_s15 = sshll.u32 %s1730_s14, 3  ;;  %s1383_s16 = sshll.u32 %s1274_s9, 7 }
  0x1c   : > { %p1385_p7 = pnand %p920_p5, %p65_p4  ;;  %s1731_s19 = sand.u32 1, %s1278_s10  }
  0x1d   : > { %s1390_s18 = scalar_select %p54_p6, %s1266_s29, %s56_s12  }
  0x1e   : > { %s1761_s17 = scalar_select %p1385_p7, 1, 0 }
  0x1f   : > { %1762 = sst [smem:[#allocation27_spill]] %s1390_s18  ;;  %s1763_s1 = sld [smem:[#allocation30_spill]] }
  0x20   : > { %s351_s23 = scalar_lea.vmem [#allocation5], %s1380_s15  ;;  %s1404_s25 = scalar_lea.sflag [#allocation6], %s1731_s19 }
  0x21   : > { %s359_s24 = sshll.u32 %s351_s23, 4  ;;  %p1410_p9 = pneg %p1385_p7  ;;  %s1400_s24 = int_to_ptr.vmem [resolvable:$true] %s359_s24 }
  0x23   : > { %s1764_s12 = scalar_select %p1410_p9, 1, 0 }
  0x25   : > { %s1397_s22 = scalar_lea.hbm %s1763_s1, %s1383_s16  ;;  %s979_s21 = scalar_lea.hbm %s1763_s1, 256 }
  0x26   : > { %s974_s26 = scalar_lea.hbm %s1397_s22, 128  ;;  %p980_p12 = scmp.lt.u32.totalorder %s1397_s22, %s1763_s1 }
  0x27   : > { %p975_p8 = scmp.ne.s32.totalorder %s1397_s22, %s974_s26  ;;  %p981_p13 = scmp.lt.u32.totalorder %s979_s21, %s974_s26 }
  0x28   : > { %p983_p2 = scmp.lt.u32.totalorder %s974_s26, %s1397_s22 }
  0x29   : > { %p977_p10 = pnand %p1410_p9, %p975_p8  ;;  %p982_p0 = por %p981_p13, %p980_p12 }
  0x2b   : > { %p978_p11 = pneg %p977_p10  ;;  %p984_p4 = por %p983_p2, %p982_p0 }
  0x2d   : > { %p985_p5 = pnand %p984_p4, %p978_p11 }
  0x2f   : > { %988 = shalt.err (!%p985_p5)
}
  0x30   : > { %s989_s19 = scalar_lea.vmem %s1400_s24, 128  ;;  %s1280_s13 = smov [#allocation5]  }
  0x31   : > { %p990_p6 = scmp.ne.s32.totalorder %s1400_s24, %s989_s19  ;;  %s994_s20 = sshll.u32 %s1280_s13, 4  ;;  %s995_s20 = int_to_ptr.vmem [resolvable:$false] %s994_s20 }
  0x32   : > { %s996_s14 = scalar_lea.vmem %s995_s20, 256  ;;  %p997_p3 = scmp.lt.s32.totalorder %s1400_s24, %s995_s20 }
  0x33   : > { %p992_p8 = pnand %p990_p6, %p1410_p9  ;;  %p998_p1 = scmp.lt.s32.totalorder %s996_s14, %s989_s19 }
  0x35   : > { %p993_p10 = pneg %p992_p8  ;;  %p999_p12 = por %p998_p1, %p997_p3 }
  0x37   : > { %p1000_p13 = pnand %p999_p12, %p993_p10 }
  0x39   : > { %1003 = shalt.err (!%p1000_p13)
}
  0x3a   : > { %902 = dma.hbm_to_vmem [thread:$0]  (!%p1385_p7), %s1397_s22, 128, %s1400_s24, %s1404_s25  }
  0x3b   : > { %s1765_s3 = sld [smem:[#allocation31_spill]]  ;;  %s389_s19 = scalar_lea.vmem [#allocation8], %s1380_s15 }
  0x3c   : > { %s397_s13 = sshll.u32 %s389_s19, 4  ;;  %s1766_s20 = sand.u32 1, %s1278_s10   ;;  %s398_s13 = int_to_ptr.vmem [resolvable:$true] %s397_s13 }
  0x3d   : > { %s1443_s14 = scalar_lea.sflag [#allocation9], %s1766_s20 }
  0x41   : > { %s1438_s23 = scalar_lea.hbm %s1765_s3, %s1383_s16  ;;  %s1009_s26 = scalar_lea.hbm %s1765_s3, 256 }
  0x42   : > { %s1004_s1 = scalar_lea.hbm %s1438_s23, 128  ;;  %p1010_p0 = scmp.lt.u32.totalorder %s1438_s23, %s1765_s3 }
  0x43   : > { %p1005_p1 = scmp.ne.s32.totalorder %s1438_s23, %s1004_s1  ;;  %p1011_p2 = scmp.lt.u32.totalorder %s1009_s26, %s1004_s1 }
  0x44   : > { %p1013_p5 = scmp.lt.u32.totalorder %s1004_s1, %s1438_s23 }
  0x45   : > { %p1007_p3 = pnand %p1005_p1, %p1410_p9  ;;  %p1012_p4 = por %p1011_p2, %p1010_p0 }
  0x47   : > { %p1008_p11 = pneg %p1007_p3  ;;  %p1014_p6 = por %p1013_p5, %p1012_p4 }
  0x49   : > { %p1015_p8 = pnand %p1014_p6, %p1008_p11 }
  0x4b   : > { %1018 = shalt.err (!%p1015_p8)
}
  0x4c   : > { %s1019_s19 = scalar_lea.vmem %s398_s13, 128  ;;  %s1281_s20 = smov [#allocation8]  }
  0x4d   : > { %p1020_p10 = scmp.ne.s32.totalorder %s398_s13, %s1019_s19  ;;  %s1024_s9 = sshll.u32 %s1281_s20, 4  ;;  %s1025_s9 = int_to_ptr.vmem [resolvable:$false] %s1024_s9 }
  0x4e   : > { %s1026_s22 = scalar_lea.vmem %s1025_s9, 256  ;;  %p1027_p1 = scmp.lt.s32.totalorder %s398_s13, %s1025_s9 }
  0x4f   : > { %p1022_p12 = pnand %p1020_p10, %p1410_p9  ;;  %p1028_p3 = scmp.lt.s32.totalorder %s1026_s22, %s1019_s19 }
  0x51   : > { %p1023_p13 = pneg %p1022_p12  ;;  %p1029_p7 = por %p1028_p3, %p1027_p1 }
  0x53   : > { %p1030_p0 = pnand %p1029_p7, %p1023_p13 }
  0x55   : > { %1033 = shalt.err (!%p1030_p0)
}
  0x56   : > { %p1767_p2 = scmp.ne.s32.totalorder %s1761_s17, 0  ;;  %s1464_s1 = sadd.s32 4294967295, %s1278_s10  }
  0x57   : > { %s844_s9 = sadd.s32 4294967294, %s1278_s10   ;;  %p69_p7 = scmp.ne.s32.totalorder %s1262_s28, %s1258_s27 }
  0x58   : > { %908 = dma.hbm_to_vmem [thread:$0]  (!%p1767_p2), %s1438_s23, 128, %s398_s13, %s1443_s14  }
  0x59   : > { %p1743_p11 = scmp.eq.s32.totalorder %s1464_s1, 0  ;;  %p261_p4 = scmp.eq.s32.totalorder %s1464_s1, 1 }
  0x5a   : > { %p267_p5 = scmp.eq.s32.totalorder %s844_s9, 1  ;;  %p845_p8 = scmp.ge.s32.totalorder %s1278_s10, 1 }
  0x5b   : > { %p1473_p6 = por %p1743_p11, %p69_p7  ;;  %p1769_p10 = scmp.ne.s32.totalorder %s1266_s29, %s1262_s28 }
  0x5c   : > { %p1485_p13 = por %p267_p5, %p69_p7  ;;  %p302_p1 = scmp.lt.s32.totalorder %s1278_s10, 3 }
  0x5d   : > { %s1768_s11 = scalar_select %p1473_p6, 1, 0 }
  0x5e   : > { %p1481_p12 = por %p261_p4, %p1769_p10  ;;  %p1490_p3 = pnand %p845_p8, %p302_p1 }
  0x5f   : > { %s1771_s13 = scalar_select %p1485_p13, 1, 0 }
  0x60   : > { %s1770_s23 = scalar_select %p1481_p12, 1, 0 }
  0x61   : > { %1772 = sst [smem:[#allocation28_spill]] %s1771_s13  ;;  %s1282_s26 = smov [#allocation11]  }
  0x62   : > { %s1773_s24 = scalar_select %p1490_p3, 1, 0 }
  0x63   : > { %s317_s21 = sshll.u32 %s1282_s26, 4  ;;  %p892_p0 = pneg %p1490_p3  ;;  %s1494_s21 = int_to_ptr.vmem [resolvable:$true] %s317_s21 }
  0x64   : > { %s1774_s0 = sld [smem:[#allocation29_spill]]  ;;  %s332_s9 = scalar_lea.vmem [#allocation2], %s1380_s15 }
  0x65   : > { %s340_s3 = sshll.u32 %s332_s9, 4  ;;  %p1507_p7 = pnand %p892_p0, %p1743_p11  ;;  %s341_s3 = int_to_ptr.vmem [resolvable:$true] %s340_s3 }
  0x66   : > { %s1776_s26 = sand.u32 1, %s1266_s29  }
  0x67   : > { %s1775_s18 = scalar_select %p1507_p7, 1, 0 }
  0x68   : > { %s329_s10 = scalar_lea.sflag [#allocation3], %s1776_s26 }
  0x6a   : > { %s1502_s22 = scalar_lea.hbm %s1774_s0, %s1383_s16  ;;  %s1039_s27 = scalar_lea.hbm %s1774_s0, 256 }
  0x6b   : > { %s1034_s13 = scalar_lea.hbm %s1502_s22, 128  ;;  %p1040_p10 = scmp.lt.u32.totalorder %s1502_s22, %s1774_s0 }
  0x6c   : > { %p1035_p4 = scmp.ne.s32.totalorder %s1502_s22, %s1034_s13  ;;  %p1041_p1 = scmp.lt.u32.totalorder %s1039_s27, %s1034_s13 }
  0x6d   : > { %p1043_p11 = scmp.lt.u32.totalorder %s1034_s13, %s1502_s22 }
  0x6e   : > { %p1037_p5 = pnand %p1035_p4, %p1410_p9  ;;  %p1042_p0 = por %p1041_p1, %p1040_p10 }
  0x70   : > { %p1038_p8 = pneg %p1037_p5  ;;  %p1044_p13 = por %p1043_p11, %p1042_p0 }
  0x72   : > { %p1045_p12 = pnand %p1044_p13, %p1038_p8 }
  0x74   : > { %1048 = shalt.err (!%p1045_p12)
}
  0x75   : > { %s1049_s9 = scalar_lea.vmem %s341_s3, 128  ;;  %s1283_s26 = smov [#allocation2]  }
  0x76   : > { %p1050_p6 = scmp.ne.s32.totalorder %s341_s3, %s1049_s9  ;;  %s1054_s29 = sshll.u32 %s1283_s26, 4  ;;  %s1055_s29 = int_to_ptr.vmem [resolvable:$false] %s1054_s29 }
  0x77   : > { %s1056_s19 = scalar_lea.vmem %s1055_s29, 256  ;;  %p1057_p3 = scmp.lt.s32.totalorder %s341_s3, %s1055_s29 }
  0x78   : > { %p1052_p4 = pnand %p1050_p6, %p1410_p9  ;;  %p1058_p7 = scmp.lt.s32.totalorder %s1056_s19, %s1049_s9 }
  0x7a   : > { %p1053_p5 = pneg %p1052_p4  ;;  %p1059_p2 = por %p1058_p7, %p1057_p3 }
  0x7c   : > { %p1060_p1 = pnand %p1059_p2, %p1053_p5 }
  0x7e   : > { %1063 = shalt.err (!%p1060_p1)
}
  0x7f   : > { %p1777_p10 = scmp.ne.s32.totalorder %s1761_s17, 0  ;;  %s1534_s27 = scalar_lea.hbm %s1723_s2, %s1383_s16 }
  0x80   : > { %s1064_s26 = scalar_lea.hbm %s1727_s6, 128  ;;  %p1778_p11 = scmp.ne.s32.totalorder %s1775_s18, 0 }
  0x81   : > { %899 = dma.hbm_to_vmem [thread:$0]  (!%p1777_p10), %s1502_s22, 128, %s341_s3, %s329_s10  }
  0x82   : > { %p1065_p2 = scmp.ne.s32.totalorder %s1727_s6, %s1064_s26  ;;  %p1066_p6 = pneg %p1778_p11 }
  0x83   : > { %p1071_p3 = scmp.lt.u32.totalorder %s1064_s26, %s1727_s6 }
  0x84   : > { %p1067_p12 = pnand %p1066_p6, %p1065_p2 }
  0x86   : > { %p1068_p13 = pneg %p1067_p12 }
  0x88   : > { %p1073_p7 = pnand %p1071_p3, %p1068_p13 }
  0x8a   : > { %1076 = shalt.err (!%p1073_p7)
}
  0x8b   : > { %s1077_s3 = scalar_lea.vmem %s1494_s21, 128  ;;  %p1085_p5 = scmp.lt.s32.totalorder %s1494_s21, %s1494_s21 }
  0x8c   : > { %p1078_p8 = scmp.ne.s32.totalorder %s1494_s21, %s1077_s3  ;;  %p1086_p1 = scmp.lt.s32.totalorder %s1077_s3, %s1077_s3 }
  0x8e   : > { %p1080_p0 = pnand %p1078_p8, %p1066_p6  ;;  %p1087_p10 = por %p1086_p1, %p1085_p5 }
  0x90   : > { %p1081_p4 = pneg %p1080_p0 }
  0x92   : > { %p1088_p9 = pnand %p1087_p10, %p1081_p4 }
  0x94   : > { %1091 = shalt.err (!%p1088_p9)
}
  0x95   : > { %895 = dma.hbm_to_vmem [thread:$0]  (!%p1778_p11), %s1727_s6, 128, %s1494_s21, [#allocation12]  }
  0x96   : > { %s370_s22 = scalar_lea.vmem [#allocation7], %s1380_s15  ;;  %s1562_s20 = scalar_lea.hbm %s1725_s4, %s1383_s16 }
  0x97   : > { %s378_s7 = sshll.u32 %s370_s22, 4  ;;  %s1092_s18 = scalar_lea.hbm %s1534_s27, 128  ;;  %s379_s7 = int_to_ptr.vmem [resolvable:$true] %s378_s7 }
  0x98   : > { %p1093_p9 = scmp.ne.s32.totalorder %s1534_s27, %s1092_s18  ;;  %p1779_p10 = scmp.ne.s32.totalorder %s1764_s12, 0 }
  0x99   : > { %s1097_s9 = scalar_lea.hbm %s1723_s2, 256  ;;  %p1098_p11 = scmp.lt.u32.totalorder %s1534_s27, %s1723_s2 }
  0x9a   : > { %p1095_p2 = pnand %p1093_p9, %p1779_p10  ;;  %p1099_p12 = scmp.lt.u32.totalorder %s1097_s9, %s1092_s18 }
  0x9b   : > { %p1101_p3 = scmp.lt.u32.totalorder %s1092_s18, %s1534_s27 }
  0x9c   : > { %p1096_p6 = pneg %p1095_p2  ;;  %p1100_p13 = por %p1099_p12, %p1098_p11 }
  0x9e   : > { %p1102_p7 = por %p1101_p3, %p1100_p13 }
  0xa0   : > { %p1103_p8 = pnand %p1102_p7, %p1096_p6 }
  0xa2   : > { %1106 = shalt.err (!%p1103_p8)
}
  0xa3   : > { %s1107_s16 = scalar_lea.vmem %s379_s7, 128  ;;  %s1284_s21 = smov [#allocation7]  }
  0xa4   : > { %p1108_p0 = scmp.ne.s32.totalorder %s379_s7, %s1107_s16  ;;  %s1112_s0 = sshll.u32 %s1284_s21, 4  ;;  %s1113_s0 = int_to_ptr.vmem [resolvable:$false] %s1112_s0 }
  0xa5   : > { %s1114_s10 = scalar_lea.vmem %s1113_s0, 256  ;;  %p1115_p1 = scmp.lt.s32.totalorder %s379_s7, %s1113_s0 }
  0xa6   : > { %p1110_p4 = pnand %p1108_p0, %p1779_p10  ;;  %p1116_p9 = scmp.lt.s32.totalorder %s1114_s10, %s1107_s16 }
  0xa8   : > { %p1111_p5 = pneg %p1110_p4  ;;  %p1117_p2 = por %p1116_p9, %p1115_p1 }
  0xaa   : > { %p1118_p11 = pnand %p1117_p2, %p1111_p5 }
  0xac   : > { %1121 = shalt.err (!%p1118_p11)
}
  0xad   : > { %p1780_p12 = scmp.ne.s32.totalorder %s1761_s17, 0  ;;  %s408_s22 = scalar_lea.vmem [#allocation10], %s1380_s15 }
  0xae   : > { %s416_s8 = sshll.u32 %s408_s22, 4  ;;  %s1122_s13 = scalar_lea.hbm %s1562_s20, 128  ;;  %s417_s8 = int_to_ptr.vmem [resolvable:$true] %s416_s8 }
  0xaf   : > { %905 = dma.hbm_to_vmem [thread:$0]  (!%p1780_p12), %s1534_s27, 128, %s379_s7, %s1404_s25  }
  0xb0   : > { %p1123_p6 = scmp.ne.s32.totalorder %s1562_s20, %s1122_s13  ;;  %s1127_s29 = scalar_lea.hbm %s1725_s4, 256 }
  0xb1   : > { %p1128_p7 = scmp.lt.u32.totalorder %s1562_s20, %s1725_s4  ;;  %p1129_p8 = scmp.lt.u32.totalorder %s1127_s29, %s1122_s13 }
  0xb2   : > { %p1125_p13 = pnand %p1123_p6, %p1779_p10  ;;  %p1131_p4 = scmp.lt.u32.totalorder %s1122_s13, %s1562_s20 }
  0xb3   : > { %p1130_p0 = por %p1129_p8, %p1128_p7 }
  0xb4   : > { %p1126_p3 = pneg %p1125_p13 }
  0xb5   : > { %p1132_p5 = por %p1131_p4, %p1130_p0 }
  0xb7   : > { %p1133_p1 = pnand %p1132_p5, %p1126_p3 }
  0xb9   : > { %1136 = shalt.err (!%p1133_p1)
}
  0xba   : > { %s1137_s15 = scalar_lea.vmem %s417_s8, 128  ;;  %s1285_s25 = smov [#allocation10]  }
  0xbb   : > { %p1138_p9 = scmp.ne.s32.totalorder %s417_s8, %s1137_s15  ;;  %s1142_s27 = sshll.u32 %s1285_s25, 4  ;;  %s1143_s27 = int_to_ptr.vmem [resolvable:$false] %s1142_s27 }
  0xbc   : > { %s1144_s7 = scalar_lea.vmem %s1143_s27, 256  ;;  %p1145_p6 = scmp.lt.s32.totalorder %s417_s8, %s1143_s27 }
  0xbd   : > { %p1140_p2 = pnand %p1138_p9, %p1779_p10  ;;  %p1146_p13 = scmp.lt.s32.totalorder %s1144_s7, %s1137_s15 }
  0xbf   : > { %p1141_p11 = pneg %p1140_p2  ;;  %p1147_p12 = por %p1146_p13, %p1145_p6 }
  0xc1   : > { %p1148_p7 = pnand %p1147_p12, %p1141_p11 }
  0xc3   : > { %1151 = shalt.err (!%p1148_p7)
}
  0xc4   : > { %p1781_p8 = scmp.ne.s32.totalorder %s1761_s17, 0  ;;  %p1782_p3 = scmp.ne.s32.totalorder %s1773_s24, 0 }
  0xc5   : > { %s1604_s12 = sand.u32 (!%p1782_p3), 1, %s1262_s28   ;;  %p1783_p10 = scmp.ne.s32.totalorder (!%p1782_p3), %s1768_s11, 0 }
  0xc6   : > { %911 = dma.hbm_to_vmem [thread:$0]  (!%p1781_p8), %s1562_s20, 128, %s417_s8, %s1443_s14  }
  0xc7   : > { %435 = sbr.rel (%p1782_p3) target bundleno = 273 (0x111), region = 48  ;;  %s1607_s3 = sshll.u32 (!%p1782_p3), %s1604_s12, 3 }
  0xc8   : > { %s438_s16 = scalar_lea.sflag (!%p1782_p3), [#allocation3], %s1604_s12  ;;  %s441_s21 = scalar_lea.vmem (!%p1782_p3), [#allocation2], %s1607_s3 }
  0xce   : > { %1233 = dma.done.wait (%p1783_p10), %s438_s16, 128  }
  0xcf   : > { %1235 = vsyncadd (%p1783_p10), %s438_s16, 4294967168  ;;  %s446_s17 = sand.u32 1, %s1464_s1   ;;  %s450_s24 = scalar_lea.vmem [#allocation5], %s1607_s3 }
  0xd0   : > { %s447_s14 = scalar_lea.sflag [#allocation6], %s446_s17 }
  0xd1   : > { %1237 = dma.done.wait (%p1783_p10), %s447_s14, 256  }
  0xd2   : > { %1239 = vsyncadd (%p1783_p10), %s447_s14, 4294967040  ;;  %s459_s20 = scalar_lea.vmem [#allocation7], %s1607_s3  ;;  %s465_s0 = scalar_lea.sflag [#allocation9], %s446_s17 }
  0xd3   : > { %s468_s10 = scalar_lea.vmem [#allocation8], %s1607_s3 }
  0xd4   : > { %1241 = dma.done.wait (%p1783_p10), %s465_s0, 256  }
  0xd5   : > { %1243 = vsyncadd (%p1783_p10), %s465_s0, 4294967040  ;;  %s477_s22 = scalar_lea.vmem [#allocation10], %s1607_s3  ;;  %p1784_p12 = scmp.eq.s32.totalorder %s1464_s1, 0 }
  0xd7   : > { %1245 = dma.done.wait (%p1784_p12), [#allocation12], 128   ;;  %p1785_p0 = pmov %p1784_p12 }
  0xd8   : > { %p546_p4 = scmp.lt.s32.totalorder %s1270_s30, 1  ;;  %v553_v0 = vld [vmem:[%s441_s21] sm:$0xff]  ;;  %v554_v1 = vld [vmem:[%s450_s24] sm:$0xff]  ;;  %s538_s1 = scalar_lea.vmem [#allocation13], %s1607_s3 }
  0xd9   : > { %1247 = vsyncadd (%p1785_p0), [#allocation12], 4294967168  ;;  %v570_v2 = vmul.f32 %v553_v0, %v553_v0  ;;  %v571_v3 = vmul.f32 %v554_v1, %v554_v1  ;;  %v559_v4 = vld [vmem:[#allocation11] sm:$0xff]  ;;  %v555_v5 = vld [vmem:[%s459_s20] sm:$0xff]  ;;  %s599_s29 = sshll.u32 %s538_s1, 4  ;;  %s545_s9 = scalar_lea.vmem [#allocation14], %s1607_s3  ;;  %s1640_s29 = int_to_ptr.vmem [resolvable:$true] %s599_s29 }
  0xda   : > { %s547_s8 = scalar_select %p546_p4, %s1270_s30, 1  ;;  %v556_v6 = vld [vmem:[%s468_s10] sm:$0xff]  ;;  %v560_v9 = vmul.f32 %v555_v5, %v553_v0  ;;  %v566_v12 = vmul.f32 %v555_v5, %v554_v1  ;;  %v557_v13 = vld [vmem:[%s477_s22] sm:$0xff] }
  0xdb   : > { %v572_v7 = vadd.f32 %v571_v3, %v570_v2  ;;  %v561_v10 = vmul.f32 %v556_v6, %v554_v1  ;;  %v565_v11 = vmul.f32 %v556_v6, %v553_v0  ;;  %v563_v16 = vmul.f32 %v559_v4, %v557_v13  ;;  %s613_s19 = sshll.u32 %s545_s9, 4  ;;  %s870_s15 = sshll.u32 %s1270_s30, 7  ;;  %s1642_s19 = int_to_ptr.vmem [resolvable:$true] %s613_s19 }
  0xdc   : > { %s867_s13 = sshll.u32 %s547_s8, 3  ;;  %s1786_s7 = sld [smem:[#allocation32_spill]] }
  0xdd   : > { %s552_s26 = scalar_lea.vmem %s1726_s5, %s867_s13  ;;  %v573_v8 = vadd.f32 %v572_v7, %v559_v4  ;;  %v562_v15 = vadd.f32 %v561_v10, %v560_v9  ;;  %v567_v17 = vsub.f32 %v565_v11, %v566_v12  ;;  %s1787_s3 = sld [smem:[#allocation33_spill]] }
  0xde   : > { %v558_v14 = vld [vmem:[%s552_s26] sm:$0xff]  ;;  %s580_s30 = scalar_lea.sflag [#allocation4], %s1604_s12  ;;  %s1152_s24 = scalar_lea.vmem %s1640_s29, 128 }
  0xdf   : > { %972 = vrcp.f32 %v573_v8  ;;  %v568_v18 = vmul.f32 %v559_v4, %v558_v14  ;;  %v564_v19 = vadd.f32 %v563_v16, %v562_v15  ;;  %p1153_p5 = scmp.ne.s32.totalorder %s1640_s29, %s1152_s24  ;;  %p1788_p1 = scmp.ne.s32.totalorder %s1770_s23, 0 }
  0xe0   : > { %s1286_s20 = smov [#allocation13]  }
  0xe1   : > { %v569_v20 = vadd.f32 %v568_v18, %v567_v17  ;;  %p1154_p9 = pnand %p1153_p5, %p1788_p1  ;;  %s1156_s0 = sshll.u32 %s1286_s20, 4  ;;  %s1157_s0 = int_to_ptr.vmem [resolvable:$false] %s1156_s0 }
  0xe2   : > { %s1647_s16 = scalar_lea.hbm %s1786_s7, %s870_s15  ;;  %s1158_s10 = scalar_lea.vmem %s1157_s0, 256 }
  0xe3   : > { %s1652_s14 = scalar_lea.hbm %s1787_s3, %s870_s15  ;;  %p1155_p2 = pneg %p1154_p9 }
  0xe4   : > { %p1159_p11 = scmp.lt.s32.totalorder %s1640_s29, %s1157_s0  ;;  %p1160_p6 = scmp.lt.s32.totalorder %s1158_s10, %s1152_s24 }
  0xe6   : > { %p1161_p13 = por %p1160_p6, %p1159_p11 }
  0xe8   : > { %p1162_p7 = pnand %p1161_p13, %p1155_p2 }
  0xe9   : > { %v973_v21 = vpop.eup %972 }
  0xea   : > { %v575_v22 = vmul.f32 %v973_v21, %v564_v19  ;;  %v577_v23 = vmul.f32 %v973_v21, %v569_v20 }
  0xec   : > { %576 = vst [vmem:[%s538_s1] sm:$0xff] %v575_v22  ;;  %578 = vst [vmem:[%s545_s9] sm:$0xff] %v577_v23 }
  0xed   : > { %1165 = shalt.err (!%p1162_p7)
}
  0xee   : > { %s1166_s22 = scalar_lea.hbm %s1647_s16, 128  ;;  %s1170_s11 = scalar_lea.hbm %s1786_s7, 256 }
  0xef   : > { %p1167_p8 = scmp.ne.s32.totalorder %s1647_s16, %s1166_s22  ;;  %p1171_p12 = scmp.lt.u32.totalorder %s1647_s16, %s1786_s7 }
  0xf0   : > { %p1172_p0 = scmp.lt.u32.totalorder %s1170_s11, %s1166_s22  ;;  %p1174_p5 = scmp.lt.u32.totalorder %s1166_s22, %s1647_s16 }
  0xf1   : > { %p1168_p3 = pnand %p1167_p8, %p1788_p1 }
  0xf2   : > { %p1173_p4 = por %p1172_p0, %p1171_p12 }
  0xf3   : > { %p1169_p10 = pneg %p1168_p3 }
  0xf4   : > { %p1175_p9 = por %p1174_p5, %p1173_p4 }
  0xf6   : > { %p1176_p2 = pnand %p1175_p9, %p1169_p10 }
  0xf8   : > { %1179 = shalt.err (!%p1176_p2)
}
  0xf9   : > { %888 = dma.vmem_to_hbm [thread:$0]  (%p1788_p1), %s1640_s29, 128, %s1647_s16, %s580_s30  }
  0xfa   : > { %s585_s1 = scalar_lea.sflag [#allocation15], %s1604_s12  ;;  %s1180_s9 = scalar_lea.vmem %s1642_s19, 128 }
  0xfb   : > { %p1181_p11 = scmp.ne.s32.totalorder %s1642_s19, %s1180_s9  ;;  %s1287_s15 = smov [#allocation14]  }
  0xfc   : > { %s1184_s25 = sshll.u32 %s1287_s15, 4  ;;  %s1185_s25 = int_to_ptr.vmem [resolvable:$false] %s1184_s25 }
  0xfd   : > { %p1182_p6 = pnand %p1181_p11, %p1788_p1  ;;  %s1186_s27 = scalar_lea.vmem %s1185_s25, 256 }
  0xfe   : > { %p1187_p7 = scmp.lt.s32.totalorder %s1642_s19, %s1185_s25  ;;  %p1188_p8 = scmp.lt.s32.totalorder %s1186_s27, %s1180_s9 }
  0xff   : > { %p1183_p13 = pneg %p1182_p6 }
 0x100   : > { %p1189_p3 = por %p1188_p8, %p1187_p7 }
 0x102   : > { %p1190_p10 = pnand %p1189_p3, %p1183_p13 }
 0x104   : > { %1193 = shalt.err (!%p1190_p10)
}
 0x105   : > { %s1194_s12 = scalar_lea.hbm %s1652_s14, 128  ;;  %s1198_s21 = scalar_lea.hbm %s1787_s3, 256 }
 0x106   : > { %p1195_p12 = scmp.ne.s32.totalorder %s1652_s14, %s1194_s12  ;;  %p1199_p5 = scmp.lt.u32.totalorder %s1652_s14, %s1787_s3 }
 0x107   : > { %p1200_p9 = scmp.lt.u32.totalorder %s1198_s21, %s1194_s12  ;;  %p1202_p11 = scmp.lt.u32.totalorder %s1194_s12, %s1652_s14 }
 0x108   : > { %p1196_p0 = pnand %p1195_p12, %p1788_p1 }
 0x109   : > { %p1201_p2 = por %p1200_p9, %p1199_p5 }
 0x10a   : > { %p1197_p4 = pneg %p1196_p0 }
 0x10b   : > { %p1203_p6 = por %p1202_p11, %p1201_p2 }
 0x10d   : > { %p1204_p13 = pnand %p1203_p6, %p1197_p4 }
 0x10f   : > { %1207 = shalt.err (!%p1204_p13)
}
 0x110   : > { %889 = dma.vmem_to_hbm [thread:$0]  (%p1788_p1), %s1642_s19, 128, %s1652_s14, %s585_s1  }
 0x111 PF: > { %s1789_s24 = sld [smem:[#allocation22_spill]]  ;;  %s1790_s20 = sld [smem:[#allocation28_spill]] }
 0x112   : > { %s1791_s0 = sld [smem:[#allocation25_spill]] }
 0x117   : > { %s625_s10 = sand.u32 1, %s1789_s24   ;;  %p1792_p7 = scmp.ne.s32.totalorder %s1790_s20, 0 }
 0x118   : > { %p1793_p8 = scmp.ge.s32.totalorder %s1791_s0, 2  ;;  %s626_s22 = scalar_lea.sflag [#allocation4], %s625_s10 }
 0x11a   : > { %p913_p3 = pnand %p1793_p8, %p1792_p7 }
 0x11c   : > { %1249 = dma.done.wait (!%p913_p3), %s626_s22, 128  }
 0x11d   : > { %1251 = vsyncadd (!%p913_p3), %s626_s22, 4294967168  ;;  %s635_s8 = scalar_lea.sflag [#allocation15], %s625_s10 }
 0x11e   : > { %1253 = dma.done.wait (!%p913_p3), %s635_s8, 128  }
 0x11f   : > { %1255 = vsyncadd (!%p913_p3), %s635_s8, 4294967168  ;;  %s35_s10 = sadd.s32 1, %s1791_s0   ;;  %s1794_s23 = sld [smem:[#allocation23_spill]] }
 0x120   : > { %p32_p10 = scmp.ge.s32.totalorder %s35_s10, 4   ;;  %s1795_s29 = sld [smem:[#allocation27_spill]] }
 0x121   : > { %s1796_s30 = sld [smem:[#allocation24_spill]]  ;;  %s1797_s9 = sld [smem:[#allocation26_spill]] }
 0x122   : > { %s1798_s27 = smov %s1262_s28  ;;  %34 = sbr.rel (!%p32_p10) target bundleno = 19 (0x13), region = 166 }
 0x125   : > { %s1799_s28 = smov %s1794_s23 }
 0x129   :  { %640 = vsyncpa [#allocation3], 1 }
 0x12a   :  { %642 = vsyncpa [#allocation3 + $0x1], 1 }
 0x12b   :  { %643 = vsyncpa [#allocation6], 1 }
 0x12c   :  { %645 = vsyncpa [#allocation6 + $0x1], 1 }
 0x12d   :  { %646 = vsyncpa [#allocation9], 1 }
 0x12e   :  { %648 = vsyncpa [#allocation9 + $0x1], 1 }
 0x12f   :  { %649 = vsyncpa [#allocation12], 1 }
 0x130   :  { %650 = vsyncpa [#allocation4], 1 }
 0x131   :  { %652 = vsyncpa [#allocation4 + $0x1], 1 }
 0x132   :  { %653 = vsyncpa [#allocation15], 1 }
 0x133   :  { %655 = vsyncpa [#allocation15 + $0x1], 1 }

</bundles_post_ra>
